<compile_context>
chip_gen: v5e
topology: v5e:2x2
jax: 0.10.0
libtpu: 0.0.40
codegen_flags: <defaults>
</compile_context>

<pallas_src>
import functools

import jax
import jax.numpy as jnp
from jax.experimental import pallas as pl
from jax.experimental.pallas import tpu as pltpu


def _round_up(x, m):
    return ((x + m - 1) // m) * m


def _vmem_capacity_bytes():
    """Physical VMEM per core; conservative (v7x-sized) fallback."""
    try:
        return int(pltpu.get_tpu_info().vmem_capacity_bytes)
    except Exception:
        return 64 << 20


def _matmul_kernel(x_ref, w_ref, o_ref, acc_ref):
    """One (tm, tn) output tile; f32 scratch accumulates over the K grid axis.

    The output BlockSpec's index_map ignores k, so o_ref is only written (and
    DMA'd back) once per (i, j) tile; the running sum lives in the f32 VMEM
    scratch so bf16/low-precision outputs never accumulate rounding error.
    """
    k = pl.program_id(2)

    @pl.when(k == 0)
    def _():
        acc_ref[...] = jnp.zeros_like(acc_ref)

    acc_ref[...] += jnp.dot(
        x_ref[...], w_ref[...], preferred_element_type=jnp.float32
    )

    @pl.when(k == pl.num_programs(2) - 1)
    def _():
        o_ref[...] = acc_ref[...].astype(o_ref.dtype)


@functools.partial(jax.jit, static_argnames=("use_bf16", "tm", "tn", "tk"))
def vortex_linear_forward(x, w, *, use_bf16=True, tm=None, tn=None, tk=None):
    """Computes x @ w with a tiled Pallas TPU kernel.

    x: (M, K), w: (K, N). Returns (M, N) in x.dtype. MXU accumulation is always
    f32; operands are bf16 by default (use_bf16=False keeps fp32 operands at
    the MXU's default fp32 precision).
    """
    M, K = x.shape
    K2, N = w.shape
    assert K == K2, "in_dim mismatch between X and W"
    out_dtype = x.dtype
    out_bytes = jnp.dtype(out_dtype).itemsize
    compute_dtype = jnp.bfloat16 if use_bf16 else jnp.float32
    in_bytes = 2 if use_bf16 else 4

    # Tile defaults sized so the double-buffered footprint stays ~10-15 MiB.
    if tm is None:
        tm = 512
    if tn is None:
        tn = 1024 if use_bf16 else 512
    if tk is None:
        tk = 1024 if use_bf16 else 512

    # Clamp tiles to the (alignment-padded) problem size; keep (8, 128) tiling.
    tm = min(tm, _round_up(M, 8))
    tn = min(tn, _round_up(N, 128))
    tk = min(tk, _round_up(K, 128))

    # Megacore: if both the M and N grid axes would be a single block, shrink
    # tn so the N ("parallel") axis has >= 2 blocks and both cores get work.
    if (
        _round_up(M, tm) == tm
        and _round_up(N, tn) == tn
        and _round_up(N, 128) >= 256
    ):
        tn = max(128, (_round_up(N, 128) // 2 // 128) * 128)

    Mp = _round_up(M, tm)
    Np = _round_up(N, tn)
    Kp = _round_up(K, tk)

    # Cast only if needed (W is pre-cast by the module); pad only if needed.
    xp = x if x.dtype == compute_dtype else x.astype(compute_dtype)
    wp = w if w.dtype == compute_dtype else w.astype(compute_dtype)
    if (Mp, Kp) != (M, K):
        xp = jnp.pad(xp, ((0, Mp - M), (0, Kp - K)))
    if (Kp, Np) != (K, N):
        wp = jnp.pad(wp, ((0, Kp - K), (0, Np - N)))

    grid = (Mp // tm, Np // tn, Kp // tk)

    # VMEM budget: double-buffered input tiles + double-buffered output tile
    # + f32 accumulator scratch, capped at 75% of physical VMEM so Mosaic's
    # internal scratch always has headroom (works out to ~96 MiB on v5e/v6e,
    # ~48 MiB on v7x).
    est_bytes = (
        2 * (tm * tk + tk * tn) * in_bytes
        + 2 * tm * tn * out_bytes
        + tm * tn * 4
    )
    cap = (_vmem_capacity_bytes() * 3) // 4
    vmem_limit = int(min(cap, max(2 * est_bytes + (8 << 20), 32 << 20)))

    out_padded = pl.pallas_call(
        _matmul_kernel,
        out_shape=jax.ShapeDtypeStruct((Mp, Np), out_dtype),
        grid_spec=pltpu.PrefetchScalarGridSpec(
            num_scalar_prefetch=0,
            grid=grid,
            in_specs=[
                pl.BlockSpec((tm, tk), lambda i, j, k: (i, k)),
                pl.BlockSpec((tk, tn), lambda i, j, k: (k, j)),
            ],
            out_specs=pl.BlockSpec((tm, tn), lambda i, j, k: (i, j)),
            scratch_shapes=[pltpu.VMEM((tm, tn), jnp.float32)],
        ),
        compiler_params=pltpu.CompilerParams(
            dimension_semantics=("parallel", "parallel", "arbitrary"),
            vmem_limit_bytes=vmem_limit,
        ),
    )(xp, wp)

    if (Mp, Np) == (M, N):
        return out_padded
    return out_padded[:M, :N]


class VortexLinearPallas:
    """JAX/Pallas counterpart of the PyTorch VortexLinear module (forward only)."""

    def __init__(self, in_dim, out_dim, init_std=0.1, key=None, use_bf16=True):
        if key is None:
            key = jax.random.PRNGKey(0)
        self.use_bf16 = use_bf16
        # Matches torch.FloatTensor(in_dim, out_dim).normal_(0, init_std) in
        # distribution (deterministic under the given key).
        self.W = init_std * jax.random.normal(
            key, (in_dim, out_dim), dtype=jnp.float32
        )
        # Per-call cast hoisted here: the kernel consumes this copy directly.
        self._W_compute = (
            self.W.astype(jnp.bfloat16) if use_bf16 else self.W
        )
        # TODO(synk): also pre-pad W to the tile grid once the deployment batch
        # size (and hence the final tile geometry) is known statically.

    def __call__(self, X):
        return vortex_linear_forward(X, self._W_compute, use_bf16=self.use_bf16)

    # TODO(synk): VortexLoss / normalLoss / fit are training utilities (loops,
    # optimizer state, host-side shuffling) — not part of the forward pass and
    # not kernelized here.


if __name__ == "__main__":
    key = jax.random.PRNGKey(0)
    k_x, k_w, k_x2, k_w2 = jax.random.split(key, 4)

    # Small demo shape matching the module's forward: X (batch, in_dim) @ W.
    batch, in_dim, out_dim = 8, 32, 16
    X = jax.random.normal(k_x, (batch, in_dim), dtype=jnp.float32)
    model = VortexLinearPallas(in_dim, out_dim, init_std=0.1, key=k_w)

    out = jax.block_until_ready(model(X))
    ref = X @ model.W
    assert out.shape == (batch, out_dim)
    assert out.dtype == X.dtype
    assert jnp.allclose(out, ref, atol=3e-2, rtol=3e-2), "mismatch vs reference"

    # Second check: non-tile-divisible shape exercising the padded, multi-block
    # grid path (multiple K steps, padded M/N/K), on both dtype paths.
    M2, K2, N2 = 300, 700, 260
    X2 = jax.random.normal(k_x2, (M2, K2), dtype=jnp.float32)
    W2 = 0.1 * jax.random.normal(k_w2, (K2, N2), dtype=jnp.float32)
    ref2 = X2 @ W2

    out2_f32 = jax.block_until_ready(
        vortex_linear_forward(X2, W2, use_bf16=False)
    )
    assert out2_f32.shape == (M2, N2)
    assert jnp.allclose(out2_f32, ref2, atol=1e-3, rtol=1e-3), "fp32 path mismatch"

    out2_bf16 = jax.block_until_ready(
        vortex_linear_forward(X2, W2, use_bf16=True)
    )
    assert out2_bf16.shape == (M2, N2)
    assert jnp.allclose(out2_bf16, ref2, atol=1e-1, rtol=5e-2), "bf16 path mismatch"

    print("KERNEL_OK")
</pallas_src>

<mosaic_0001>
module attributes {stable_mosaic.version = 11 : i64} {
  func.func @_matmul_kernel(%arg0: i32, %arg1: i32, %arg2: i32, %arg3: memref<8x128xbf16, #tpu.memory_space<vmem>>, %arg4: memref<128x128xbf16, #tpu.memory_space<vmem>>, %arg5: memref<8x128xf32, #tpu.memory_space<vmem>>, %arg6: memref<8x128xf32, #tpu.memory_space<vmem>>) attributes {dimension_semantics = [#tpu.dimension_semantics<parallel>, #tpu.dimension_semantics<parallel>, #tpu.dimension_semantics<arbitrary>], iteration_bounds = array<i64: 1, 1, 1>, scalar_prefetch = 0 : i64, scratch_operands = 1 : i64, tpu.core_type = #tpu.core_type<tc>, window_params = [{transform_indices = @transform_0, window_bounds = array<i64: 8, 128>}, {transform_indices = @transform_1, window_bounds = array<i64: 128, 128>}, {transform_indices = @transform_2, window_bounds = array<i64: 8, 128>}]} {
    %c0_i32 = arith.constant 0 : i32
    %0 = arith.cmpi eq, %arg2, %c0_i32 : i32
    %1 = arith.extui %0 : i1 to i32
    %c0_i32_0 = arith.constant 0 : i32
    %2 = arith.cmpi ne, %1, %c0_i32_0 : i32
    scf.if %2 {
      %cst_10 = arith.constant 0.000000e+00 : f32
      %12 = vector.broadcast %cst_10 : f32 to vector<8x128xf32>
      %c0_11 = arith.constant 0 : index
      %c0_12 = arith.constant 0 : index
      %13 = vector.load %arg6[%c0_11, %c0_12] : memref<8x128xf32, #tpu.memory_space<vmem>>, vector<8x128xf32>
      tpu.vector_store %arg6[%c0_11, %c0_12], %12 {strides = array<i32>} : memref<8x128xf32, #tpu.memory_space<vmem>>, vector<8x128xf32>,
    } else {
    }
    %c0 = arith.constant 0 : index
    %c0_1 = arith.constant 0 : index
    %3 = vector.load %arg6[%c0, %c0_1] : memref<8x128xf32, #tpu.memory_space<vmem>>, vector<8x128xf32>
    %c0_2 = arith.constant 0 : index
    %c0_3 = arith.constant 0 : index
    %4 = vector.load %arg3[%c0_2, %c0_3] : memref<8x128xbf16, #tpu.memory_space<vmem>>, vector<8x128xbf16>
    %c0_4 = arith.constant 0 : index
    %c0_5 = arith.constant 0 : index
    %5 = vector.load %arg4[%c0_4, %c0_5] : memref<128x128xbf16, #tpu.memory_space<vmem>>, vector<128x128xbf16>
    %cst = arith.constant dense<0.000000e+00> : vector<8x128xf32>
    %6 = tpu.matmul %4, %5, %cst {dimension_numbers = #tpu.dot_dimension_numbers<[1], [0], [0], [1], [0, 0, 1, 1], [], []>} : vector<8x128xbf16>, vector<128x128xbf16>, vector<8x128xf32> -> vector<8x128xf32>
    %7 = arith.addf %3, %6 : vector<8x128xf32>
    %c0_6 = arith.constant 0 : index
    %c0_7 = arith.constant 0 : index
    %8 = vector.load %arg6[%c0_6, %c0_7] : memref<8x128xf32, #tpu.memory_space<vmem>>, vector<8x128xf32>
    tpu.vector_store %arg6[%c0_6, %c0_7], %7 {strides = array<i32>} : memref<8x128xf32, #tpu.memory_space<vmem>>, vector<8x128xf32>,
    %c0_i32_8 = arith.constant 0 : i32
    %9 = arith.cmpi eq, %arg2, %c0_i32_8 : i32
    %10 = arith.extui %9 : i1 to i32
    %c0_i32_9 = arith.constant 0 : i32
    %11 = arith.cmpi ne, %10, %c0_i32_9 : i32
    scf.if %11 {
      %c0_10 = arith.constant 0 : index
      %c0_11 = arith.constant 0 : index
      %12 = vector.load %arg6[%c0_10, %c0_11] : memref<8x128xf32, #tpu.memory_space<vmem>>, vector<8x128xf32>
      %c0_12 = arith.constant 0 : index
      %c0_13 = arith.constant 0 : index
      %13 = vector.load %arg5[%c0_12, %c0_13] : memref<8x128xf32, #tpu.memory_space<vmem>>, vector<8x128xf32>
      tpu.vector_store %arg5[%c0_12, %c0_13], %12 {strides = array<i32>} : memref<8x128xf32, #tpu.memory_space<vmem>>, vector<8x128xf32>,
    } else {
    }
    return
  }
  func.func @transform_0(%arg0: i32, %arg1: i32, %arg2: i32) -> (i32, i32) {
    %c0_i32 = arith.constant 0 : i32
    return %arg0, %arg2 : i32, i32
  }
  func.func @transform_1(%arg0: i32, %arg1: i32, %arg2: i32) -> (i32, i32) {
    %c0_i32 = arith.constant 0 : i32
    return %arg2, %arg1 : i32, i32
  }
  func.func @transform_2(%arg0: i32, %arg1: i32, %arg2: i32) -> (i32, i32) {
    %c0_i32 = arith.constant 0 : i32
    return %arg0, %arg1 : i32, i32
  }
}

</mosaic_0001>

<bundles_post_ra>
// kernel: vortex_linear_forward.1
= control target key start
LH: loop header
LB: loop body
LE: loop exit
PB: predicated region body
PF: predicated region fallthrough
CT: control target
= control target key end

     0   :  { %s232_s0 = inlined_call_operand.vmem [shape: bf16[8,128], index: 0, kind: input, shape index: {}]   ;;  %s233_s1 = inlined_call_operand.vmem [shape: bf16[128,128], index: 1, kind: input, shape index: {}]   ;;  %s234_s2 = inlined_call_operand.hbm [shape: f32[8,128], index: 2, kind: output, shape index: {}]  }
   0x1   :  { %v158_v0 = vld [vmem:[%s233_s1 + $0x38] sm:$0xff]  ;;  %v157_v1 = vld [vmem:[%s233_s1 + $0x30] sm:$0xff] }
   0x2   :  { %83 = vmatpush.bf16.msra.mxu0 %v158_v0 }
   0x3   :  { %7 = vsyncpa [#allocation4], 0  ;;  %v156_v2 = vld [vmem:[%s233_s1 + $0x28] sm:$0xff]  ;;  %v155_v3 = vld [vmem:[%s233_s1 + $0x20] sm:$0xff]  ;;  %s186_s27 = smov [#allocation3]   ;;  %s110_s3 = sshll.u32 %s234_s2, 4  ;;  %s111_s3 = int_to_ptr.hbm [resolvable:$true] %s110_s3 }
   0x4   :  { %v154_v4 = vld [vmem:[%s233_s1 + $0x18] sm:$0xff]  ;;  %v153_v5 = vld [vmem:[%s233_s1 + $0x10] sm:$0xff]  ;;  %v152_v6 = vld [vmem:[%s233_s1 + $0x8] sm:$0xff]  ;;  %s108_s28 = sshll.u32 %s186_s27, 4  ;;  %s109_s28 = int_to_ptr.vmem [resolvable:$true] %s108_s28 }
   0x5   :  { %v151_v7 = vld [vmem:[%s233_s1] sm:$0xff] }
   0x6   :  { %84 = vmatpush.bf16.msra.mxu0 %v157_v1  ;;  %v18_v8 = vld [vmem:[%s232_s0] sm:$0xf] }
   0xa   :  { %85 = vmatpush.bf16.msra.mxu0 %v156_v2 }
   0xe   :  { %86 = vmatpush.bf16.msra.mxu0 %v155_v3 }
  0x12   :  { %87 = vmatpush.bf16.msra.mxu0 %v154_v4 }
  0x16   :  { %88 = vmatpush.bf16.msra.mxu0 %v153_v5 }
  0x1a   :  { %89 = vmatpush.bf16.msra.mxu0 %v152_v6 }
  0x1e   :  { %90 = vmatpush.bf16.msra.mxu0 %v151_v7 }
  0x21   :  { %91 = vmatmul.bf16.vlgmr.msra.gmra.mxu0 %v18_v8 }
  0x9e   :  { %v92_v9 = vpop.f32.mrf.mxu0 }
  0x9f   :  { %102 = vst [vmem:[#allocation3] sm:$0xff] %v92_v9 }
  0xa0   :  { %113 = dma.vmem_to_hbm [thread:$0]  %s109_s28, 128, %s111_s3, [#allocation4]  }
  0xa6   :  { %v94_v10 = vpop.f32.mrf.mxu0 }
  0xa7   :  { %184 = dma.done.wait [#allocation4], 128  }
  0xa8   :  { %185 = vsyncadd [#allocation4], 4294967168 }
  0xa9   :  { %118 = vsyncpa [#allocation4], 1 }

</bundles_post_ra>
